<compile_context>
chip_gen: v6e
topology: v6e:2x2x1
jax: 0.10.0
libtpu: 0.0.40
codegen_flags: <defaults>
</compile_context>

<pallas_src>
import functools

import jax
import jax.numpy as jnp
from jax.experimental import pallas as pl
from jax.experimental.pallas import tpu as pltpu


# ----------------------------- kernels --------------------------------------

def _ln_withbias_kernel(x_ref, w_ref, b_ref, o_ref, *, eps: float, inv_c: float,
                        lp_epilogue: bool):
    # x_ref: (1, C, TN)  -- C on sublanes, spatial on lanes.
    x = x_ref[0]                                           # (C, TN), input dtype
    xf = x.astype(jnp.float32)
    # Single-pass statistics over the channel (sublane) axis.
    s1 = jnp.sum(xf, axis=0, keepdims=True)                # (1, TN)
    s2 = jnp.sum(xf * xf, axis=0, keepdims=True)           # (1, TN)
    mu = s1 * inv_c
    var = jnp.maximum(s2 * inv_c - mu * mu, 0.0)           # biased var (unbiased=False)
    inv = jax.lax.rsqrt(var + eps)                         # (1, TN)
    if lp_epilogue:
        dt = x.dtype
        # w_ref/b_ref are already in the input dtype; mu/inv downcast once.
        y = (x - mu.astype(dt)) * inv.astype(dt) * w_ref[...] + b_ref[...]
        o_ref[0] = y
    else:
        y = (xf - mu) * inv * w_ref[...] + b_ref[...]      # w/b: (C,1) lane-broadcast
        o_ref[0] = y.astype(o_ref.dtype)


def _ln_biasfree_kernel(x_ref, w_ref, o_ref, *, eps: float, inv_c: float,
                        lp_epilogue: bool):
    x = x_ref[0]                                           # (C, TN), input dtype
    xf = x.astype(jnp.float32)
    s1 = jnp.sum(xf, axis=0, keepdims=True)
    s2 = jnp.sum(xf * xf, axis=0, keepdims=True)
    mu = s1 * inv_c
    var = jnp.maximum(s2 * inv_c - mu * mu, 0.0)           # mean-subtracted variance
    inv = jax.lax.rsqrt(var + eps)
    if lp_epilogue:
        dt = x.dtype
        y = x * inv.astype(dt) * w_ref[...]                # BiasFree: numerator is x
        o_ref[0] = y
    else:
        y = xf * inv * w_ref[...]
        o_ref[0] = y.astype(o_ref.dtype)


# ----------------------------- sizing helpers --------------------------------

def _vmem_capacity_bytes() -> int:
    """Physical VMEM per core; conservative 64 MiB (v7x) fallback is safe everywhere."""
    try:
        return int(pltpu.get_tpu_info().vmem_capacity_bytes)
    except Exception:
        return 64 * 1024 * 1024


def _pick_tn(c: int, hw: int, batch: int, dtype, vmem_cap: int) -> int:
    """Lane-tile width (multiple of 128) sized from the full VMEM working set."""
    itemsize = jnp.dtype(dtype).itemsize
    # Bytes of VMEM per lane of tile width:
    #   2x input double-buffer + 2x output double-buffer : 4 * C * itemsize
    #   ~3 f32 (C, TN) temporaries inside the kernel body : 3 * C * 4
    bytes_per_lane = c * (4 * itemsize + 3 * 4)
    budget = vmem_cap // 2                     # leave half of VMEM as headroom
    tn = max(128, budget // bytes_per_lane)

    # Guarantee enough grid steps for double-buffering / both v7x TensorCores.
    min_steps = 8
    steps_per_batch = max(1, -(-min_steps // batch))       # ceil(min_steps / B)
    tn = min(tn, max(128, hw // steps_per_batch))

    tn = min(tn, hw)
    if tn >= 128:
        tn = (tn // 128) * 128                 # lane-dense (unmasked) stores
    return tn


# ----------------------------- wrapper ---------------------------------------

def layer_norm_nchw(x, weight, bias=None, *, layer_norm_type="WithBias", eps=1e-5):
    """Pallas equivalent of LayerNorm(dim, LayerNorm_type).forward(x), x in NCHW."""
    b, c, h, w = x.shape
    hw = h * w
    x3 = x.reshape(b, c, hw)                   # free view of NCHW (no data movement)

    vmem_cap = _vmem_capacity_bytes()
    tn = _pick_tn(c, hw, b, x.dtype, vmem_cap)
    grid = (b, pl.cdiv(hw, tn))
    vmem_limit = min((vmem_cap * 3) // 4, 96 * 1024 * 1024)

    bias_free = (layer_norm_type == "BiasFree")
    # Low-precision epilogue: packed VALU math on v6e/v7x; numerically safe
    # everywhere (stats stay f32), so gate on dtype only.
    lp_epilogue = x.dtype in (jnp.bfloat16, jnp.float16)
    param_dtype = x.dtype if lp_epilogue else jnp.float32

    w2 = weight.astype(param_dtype).reshape(c, 1)

    in_specs = [
        pl.BlockSpec((1, c, tn), lambda i, j: (i, 0, j)),
        pl.BlockSpec((c, 1), lambda i, j: (0, 0)),
    ]
    args = [x3, w2]

    if bias_free:
        kernel = functools.partial(
            _ln_biasfree_kernel, eps=eps, inv_c=1.0 / c, lp_epilogue=lp_epilogue)
    else:
        kernel = functools.partial(
            _ln_withbias_kernel, eps=eps, inv_c=1.0 / c, lp_epilogue=lp_epilogue)
        in_specs.append(pl.BlockSpec((c, 1), lambda i, j: (0, 0)))
        args.append(bias.astype(param_dtype).reshape(c, 1))

    out = pl.pallas_call(
        kernel,
        out_shape=jax.ShapeDtypeStruct((b, c, hw), x.dtype),
        grid_spec=pltpu.PrefetchScalarGridSpec(
            num_scalar_prefetch=0,
            grid=grid,
            in_specs=in_specs,
            out_specs=pl.BlockSpec((1, c, tn), lambda i, j: (i, 0, j)),
        ),
        compiler_params=pltpu.CompilerParams(
            dimension_semantics=("parallel", "parallel"),
            vmem_limit_bytes=vmem_limit,
        ),
    )(*args)

    return out.reshape(b, c, h, w)


# ----------------------------- reference & test ------------------------------

def _reference(x, weight, bias, layer_norm_type, eps=1e-5):
    b, c, h, w = x.shape
    x3 = jnp.transpose(x, (0, 2, 3, 1)).reshape(b, h * w, c).astype(jnp.float32)
    mu = jnp.mean(x3, axis=-1, keepdims=True)
    var = jnp.mean((x3 - mu) ** 2, axis=-1, keepdims=True)
    if layer_norm_type == "BiasFree":
        y = x3 / jnp.sqrt(var + eps) * weight
    else:
        y = (x3 - mu) / jnp.sqrt(var + eps) * weight + bias
    return jnp.transpose(y.reshape(b, h, w, c), (0, 3, 1, 2)).astype(x.dtype)


if __name__ == "__main__":
    key = jax.random.PRNGKey(0)

    # Shapes implied by the module: NCHW input, LayerNorm over C.
    B, C, H, W = 2, 4, 16, 16
    x = jax.random.normal(key, (B, C, H, W), dtype=jnp.float32)

    # deterministic parameter init, matching nn.Parameter(torch.ones/zeros(dim))
    weight = jnp.ones((C,), dtype=jnp.float32)
    bias = jnp.zeros((C,), dtype=jnp.float32)

    out = jax.block_until_ready(
        layer_norm_nchw(x, weight, bias, layer_norm_type="WithBias")
    )
    ref = _reference(x, weight, bias, "WithBias")
    assert out.shape == (B, C, H, W)
    assert jnp.allclose(out, ref, atol=1e-5, rtol=1e-5)

    # BiasFree variant (no bias parameter)
    out_bf = jax.block_until_ready(
        layer_norm_nchw(x, weight, layer_norm_type="BiasFree")
    )
    ref_bf = _reference(x, weight, bias, "BiasFree")
    assert jnp.allclose(out_bf, ref_bf, atol=1e-5, rtol=1e-5)

    # Non-128-divisible spatial size: exercises the pl.cdiv partial-tile path.
    H2, W2 = 10, 13
    x2 = jax.random.normal(jax.random.PRNGKey(1), (B, C, H2, W2), dtype=jnp.float32)
    out2 = jax.block_until_ready(
        layer_norm_nchw(x2, weight, bias, layer_norm_type="WithBias")
    )
    ref2 = _reference(x2, weight, bias, "WithBias")
    assert jnp.allclose(out2, ref2, atol=1e-5, rtol=1e-5)

    # Non-f32 input: exercises the low-precision-epilogue path (stats stay f32).
    xb = x.astype(jnp.bfloat16)
    out_b = jax.block_until_ready(
        layer_norm_nchw(xb, weight, bias, layer_norm_type="WithBias")
    )
    ref_b = _reference(xb, weight, bias, "WithBias")
    assert jnp.allclose(out_b.astype(jnp.float32), ref_b.astype(jnp.float32),
                        atol=3e-2, rtol=3e-2)

    print("KERNEL_OK")
</pallas_src>

<mosaic_0001>
module attributes {stable_mosaic.version = 11 : i64} {
  func.func @_ln_withbias_kernel(%arg0: i32, %arg1: i32, %arg2: memref<1x4x128xf32, #tpu.memory_space<vmem>>, %arg3: memref<4x1xf32, #tpu.memory_space<vmem>>, %arg4: memref<4x1xf32, #tpu.memory_space<vmem>>, %arg5: memref<1x4x128xf32, #tpu.memory_space<vmem>>) attributes {dimension_semantics = [#tpu.dimension_semantics<parallel>, #tpu.dimension_semantics<parallel>], iteration_bounds = array<i64: 2, 2>, scalar_prefetch = 0 : i64, scratch_operands = 0 : i64, tpu.core_type = #tpu.core_type<tc>, window_params = [{transform_indices = @transform_0, window_bounds = array<i64: 1, 4, 128>}, {pipeline_mode = #tpu.pipeline_mode<synchronous>, transform_indices = @transform_1, window_bounds = array<i64: 4, 1>}, {pipeline_mode = #tpu.pipeline_mode<synchronous>, transform_indices = @transform_2, window_bounds = array<i64: 4, 1>}, {transform_indices = @transform_3, window_bounds = array<i64: 1, 4, 128>}]} {
    %c0 = arith.constant 0 : index
    %c0_0 = arith.constant 0 : index
    %c0_1 = arith.constant 0 : index
    %0 = vector.load %arg2[%c0, %c0_0, %c0_1] : memref<1x4x128xf32, #tpu.memory_space<vmem>>, vector<1x4x128xf32>
    %1 = vector.shape_cast %0 : vector<1x4x128xf32> to vector<4x128xf32>
    %cst = arith.constant dense<0.000000e+00> : vector<128xf32>
    %2 = vector.multi_reduction <add>, %1, %cst [0] : vector<4x128xf32> to vector<128xf32>
    %3 = vector.shape_cast %2 : vector<128xf32> to vector<1x128xf32>
    %4 = arith.mulf %1, %1 : vector<4x128xf32>
    %cst_2 = arith.constant dense<0.000000e+00> : vector<128xf32>
    %5 = vector.multi_reduction <add>, %4, %cst_2 [0] : vector<4x128xf32> to vector<128xf32>
    %6 = vector.shape_cast %5 : vector<128xf32> to vector<1x128xf32>
    %cst_3 = arith.constant 2.500000e-01 : f32
    %7 = vector.broadcast %cst_3 : f32 to vector<1x128xf32>
    %8 = arith.mulf %3, %7 : vector<1x128xf32>
    %cst_4 = arith.constant 2.500000e-01 : f32
    %9 = vector.broadcast %cst_4 : f32 to vector<1x128xf32>
    %10 = arith.mulf %6, %9 : vector<1x128xf32>
    %11 = arith.mulf %8, %8 : vector<1x128xf32>
    %12 = arith.subf %10, %11 : vector<1x128xf32>
    %cst_5 = arith.constant 0.000000e+00 : f32
    %13 = vector.broadcast %cst_5 : f32 to vector<1x128xf32>
    %14 = arith.maximumf %12, %13 : vector<1x128xf32>
    %cst_6 = arith.constant 9.99999974E-6 : f32
    %15 = vector.broadcast %cst_6 : f32 to vector<1x128xf32>
    %16 = arith.addf %14, %15 : vector<1x128xf32>
    %17 = math.rsqrt %16 : vector<1x128xf32>
    %18 = vector.broadcast %8 : vector<1x128xf32> to vector<4x128xf32>
    %19 = arith.subf %1, %18 : vector<4x128xf32>
    %20 = vector.broadcast %17 : vector<1x128xf32> to vector<4x128xf32>
    %21 = arith.mulf %19, %20 : vector<4x128xf32>
    %c0_7 = arith.constant 0 : index
    %c0_8 = arith.constant 0 : index
    %22 = vector.load %arg3[%c0_7, %c0_8] : memref<4x1xf32, #tpu.memory_space<vmem>>, vector<4x1xf32>
    %23 = vector.broadcast %22 : vector<4x1xf32> to vector<4x128xf32>
    %24 = arith.mulf %21, %23 : vector<4x128xf32>
    %c0_9 = arith.constant 0 : index
    %c0_10 = arith.constant 0 : index
    %25 = vector.load %arg4[%c0_9, %c0_10] : memref<4x1xf32, #tpu.memory_space<vmem>>, vector<4x1xf32>
    %26 = vector.broadcast %25 : vector<4x1xf32> to vector<4x128xf32>
    %27 = arith.addf %24, %26 : vector<4x128xf32>
    %c0_11 = arith.constant 0 : index
    %c0_12 = arith.constant 0 : index
    %c0_13 = arith.constant 0 : index
    %28 = vector.load %arg5[%c0_11, %c0_12, %c0_13] : memref<1x4x128xf32, #tpu.memory_space<vmem>>, vector<1x4x128xf32>
    %29 = vector.shape_cast %28 : vector<1x4x128xf32> to vector<4x128xf32>
    %30 = vector.shape_cast %27 : vector<4x128xf32> to vector<1x4x128xf32>
    tpu.vector_store %arg5[%c0_11, %c0_12, %c0_13], %30 {strides = array<i32>} : memref<1x4x128xf32, #tpu.memory_space<vmem>>, vector<1x4x128xf32>,
    return
  }
  func.func @transform_0(%arg0: i32, %arg1: i32) -> (i32, i32, i32) {
    %c0_i32 = arith.constant 0 : i32
    %c0_i32_0 = arith.constant 0 : i32
    return %arg0, %c0_i32, %arg1 : i32, i32, i32
  }
  func.func @transform_1(%arg0: i32, %arg1: i32) -> (i32, i32) {
    %c0_i32 = arith.constant 0 : i32
    %c0_i32_0 = arith.constant 0 : i32
    %c0_i32_1 = arith.constant 0 : i32
    return %c0_i32, %c0_i32_0 : i32, i32
  }
  func.func @transform_2(%arg0: i32, %arg1: i32) -> (i32, i32) {
    %c0_i32 = arith.constant 0 : i32
    %c0_i32_0 = arith.constant 0 : i32
    %c0_i32_1 = arith.constant 0 : i32
    return %c0_i32, %c0_i32_0 : i32, i32
  }
  func.func @transform_3(%arg0: i32, %arg1: i32) -> (i32, i32, i32) {
    %c0_i32 = arith.constant 0 : i32
    %c0_i32_0 = arith.constant 0 : i32
    return %arg0, %c0_i32, %arg1 : i32, i32, i32
  }
}

</mosaic_0001>

<bundles_post_ra>
// kernel: tpu_custom_call.1
= control target key start
LH: loop header
LB: loop body
LE: loop exit
PB: predicated region body
PF: predicated region fallthrough
CT: control target
= control target key end

     0   :  { %8 = vsyncpa [#allocation3], 0  ;;  %s758_s0 = inlined_call_operand.hbm [shape: f32[2,4,256], index: 0, kind: input, shape index: {}]   ;;  %s759_s1 = inlined_call_operand.vmem [shape: f32[4,1], index: 1, kind: input, shape index: {}]   ;;  %s760_s2 = inlined_call_operand.vmem [shape: f32[4,1], index: 2, kind: input, shape index: {}]   ;;  %s761_s3 = inlined_call_operand.hbm [shape: f32[2,4,256], index: 3, kind: output, shape index: {}]  }
   0x1   :  { %10 = vsyncpa [#allocation3 + $0x1], 0 }
   0x2   :  { %11 = vsyncpa [#allocation4], 0 }
   0x3   :  { %13 = vsyncpa [#allocation4 + $0x1], 0  ;;  %s592_s12 = smov 0   ;;  %s594_s13 = smov 0  }
   0x4   :  { %s596_s14 = smov 0   ;;  %s598_s15 = smov 0  }
   0x5   :  { %s600_s16 = smov 0   ;;  %s602_s17 = smov 0  }
   0x6   :  { %s604_s18 = smov 0   ;;  %s606_s19 = smov 0  }
   0x7 LB: > { %s346_s20 = sadd.s32 4294967295, %s567_s19   ;;  %s347_s21 = sadd.s32 4294967294, %s567_s19   ;;  %s567_s19 = sphi %s606_s19, %s19_s19   ;;  %s563_s18 = sphi %s604_s18, %s777_s18   ;;  %s559_s17 = sphi %s602_s17, %s776_s17   ;;  %s555_s16 = sphi %s600_s16, %s775_s16   ;;  %s551_s15 = sphi %s598_s15, %s774_s15   ;;  %s547_s14 = sphi %s596_s14, %s773_s14   ;;  %s543_s13 = sphi %s594_s13, %s772_s13   ;;  %s539_s12 = sphi %s592_s12, %s771_s12  }
   0x8   : > { %s28_s22 = sadd.s32 1, %s559_s17  ;;  %s31_s23 = sadd.s32 1, %s563_s18 }
   0x9   : > { %p29_p0 = scmp.ge.s32.totalorder %s28_s22, 2  ;;  %s40_s24 = sadd.s32 1, %s547_s14 }
   0xa   : > { %p47_p1 = scmp.ne.s32.totalorder %s547_s14, %s543_s13  ;;  %p48_p2 = scmp.eq.s32.totalorder %s567_s19, 0 }
   0xb   : > { %s779_s22 = smov (%p29_p0, %s28_s22), 0  ;;  %s781_s23 = smov (!%p29_p0, %s31_s23), %s563_s18 }
   0xc   : > { %s36_s25 = ssub.s32 %s559_s17, %s779_s22  ;;  %p645_p3 = por %p48_p2, %p47_p1 }
   0xd   : > { %p33_p4 = scmp.ge.s32.totalorder %s781_s23, 2  ;;  %p53_p5 = scmp.ne.s32.totalorder %s543_s13, %s539_s12 }
   0xe   : > { %p54_p6 = scmp.eq.s32.totalorder %s346_s20, 0  ;;  %p121_p7 = scmp.eq.s32.totalorder %s346_s20, 3 }
   0xf   : > { %s783_s23 = smov (%p33_p4, %s781_s23), 0  ;;  %p127_p10 = scmp.eq.s32.totalorder %s347_s21, 3 }
  0x10   : > { %764 = sst [smem:[#allocation8_spill]] %s783_s23  ;;  %p653_p8 = por %p54_p6, %p53_p5 }
  0x11   : > { %p657_p9 = por %p121_p7, %p47_p1  ;;  %s35_s29 = ssub.s32 %s563_s18, %s783_s23 }
  0x12   : > { %s37_s30 = sor.u32 %s36_s25, %s35_s29  ;;  %p663_p12 = por %p127_p10, %p53_p5 }
  0x13   : > { %p38_p11 = scmp.eq.s32.totalorder %s37_s30, 0  ;;  %p373_p13 = scmp.lt.s32.totalorder %s567_s19, 4 }
  0x14   : > { %s767_s4 = scalar_select %p663_p12, 1, 0 }
  0x15   : > { %s153_s5 = sand.u32 1, %s547_s14   ;;  %s351_s8 = sshll.u32 %s563_s18, 1 }
  0x16   : > { %s670_s6 = scalar_select %p38_p11, %s547_s14, %s40_s24  }
  0x17   : > { %s350_s7 = sshll.u32 %s153_s5, 2  ;;  %s162_s9 = sadd.s32 %s559_s17, %s351_s8 }
  0x18   : > { %s157_s10 = scalar_lea.vmem [#allocation2], %s350_s7  ;;  %s352_s20 = sshll.u32 %s162_s9, 6 }
  0x19   : > { %s166_s11 = sshll.u32 %s157_s10, 4  ;;  %s164_s25 = scalar_lea.hbm %s758_s0, %s352_s20  ;;  %s167_s11 = int_to_ptr.vmem [resolvable:$true] %s166_s11 }
  0x1a   : > { %p679_p0 = pnand %p373_p13, %p645_p3  ;;  %p353_p1 = scmp.ge.s32.totalorder %s567_s19, 1 }
  0x1b   : > { %p171_p2 = scmp.lt.s32.totalorder %s567_s19, 5  ;;  %s154_s24 = scalar_lea.sflag [#allocation3], %s153_s5 }
  0x1c   : > { %p445_p4 = pneg %p679_p0  ;;  %s456_s30 = scalar_lea.vmem %s167_s11, 64 }
  0x1d   : > { %p457_p5 = scmp.ne.s32.totalorder %s167_s11, %s456_s30  ;;  %s569_s7 = smov [#allocation2]  }
  0x1e   : > { %s461_s8 = sshll.u32 %s569_s7, 4  ;;  %s462_s8 = int_to_ptr.vmem [resolvable:$false] %s461_s8 }
  0x1f   : > { %p459_p6 = pnand %p457_p5, %p445_p4  ;;  %s463_s23 = scalar_lea.vmem %s462_s8, 128 }
  0x20   : > { %p464_p10 = scmp.lt.s32.totalorder %s167_s11, %s462_s8  ;;  %p465_p11 = scmp.lt.s32.totalorder %s463_s23, %s456_s30 }
  0x21   : > { %p460_p7 = pneg %p459_p6 }
  0x22   : > { %p466_p3 = por %p465_p11, %p464_p10 }
  0x24   : > { %p467_p13 = pnand %p466_p3, %p460_p7 }
  0x26   : > { %470 = shalt.err (!%p467_p13)
}
  0x27   : > { %368 = dma.hbm_to_vmem [thread:$0]  (!%p679_p0), %s164_s25, 64, %s167_s11, %s154_s24  }
  0x28   : > { %p172_p12 = pnand %p353_p1, %p171_p2 }
  0x29   : > { %s694_s26 = sand.u32 (!%p172_p12), 1, %s543_s13  }
  0x2a   : > { %175 = sbr.rel (%p172_p12) target bundleno = 193 (0xc1), region = 32  ;;  %s354_s5 = sshll.u32 (!%p172_p12), %s694_s26, 2 }
  0x2b   : > { %s178_s9 = scalar_lea.sflag (!%p172_p12), [#allocation3], %s694_s26  ;;  %s181_s10 = scalar_lea.vmem (!%p172_p12), [#allocation2], %s354_s5 }
  0x2f   : > { %530 = dma.done.wait (%p653_p8), %s178_s9, 64  }
  0x30   : > { %532 = vsyncadd (%p653_p8), %s178_s9, 4294967232  ;;  %v570_v0 = vmov 0   ;;  %v230_v1 = vld [vmem:[%s759_s1] sm:$0xf]  ;;  %vm205_vm0 = vcmask 1043456   ;;  %s357_s27 = sshll.u32 %s555_s16, 1 }
  0x31   : > { %440 = vset.pattern.permute.xlu0 %v570_v0  ;;  %v237_v2 = vld [vmem:[%s760_s2] sm:$0xf]  ;;  %s257_s29 = sadd.s32 %s551_s15, %s357_s27  ;;  %s203_s30 = scalar_lea.vmem [#allocation5], %s354_s5 }
  0x32   : > { %233 = vperm.xlu0 %440, %v230_v1   ;;  %v204_v3 = vld [vmem:[%s181_s10] sm:$0xf]  ;;  %s358_s24 = sshll.u32 %s257_s29, 6  ;;  %s261_s7 = sshll.u32 %s203_s30, 4  ;;  %s262_s7 = int_to_ptr.vmem [resolvable:$true] %s261_s7 }
  0x33   : > { %v206_v4 = vsel %vm205_vm0, %v204_v3, 0.0  ;;  %v213_v5 = vmul.f32 %v204_v3, %v204_v3  ;;  %s259_s9 = scalar_lea.hbm %s761_s3, %s358_s24  ;;  %s246_s10 = scalar_lea.sflag [#allocation4], %s694_s26 }
  0x34   : > { %v207_v6 = vrot.slane %v206_v4, 4  ;;  %s471_s11 = scalar_lea.vmem %s262_s7, 64  ;;  %s571_s15 = smov [#allocation5]  }
  0x35   : > { %v214_v7 = vsel %vm205_vm0, %v213_v5, 0.0  ;;  %p472_p8 = scmp.ne.s32.totalorder %s262_s7, %s471_s11  ;;  %s475_s16 = sshll.u32 %s571_s15, 4  ;;  %s476_s16 = int_to_ptr.vmem [resolvable:$false] %s475_s16 }
  0x36   : > { %240 = vperm.xlu0 %440, %v237_v2   ;;  %v208_v8 = vadd.f32 %v207_v6, %v206_v4  ;;  %v215_v9 = vrot.slane %v214_v7, 4  ;;  %s477_s5 = scalar_lea.vmem %s476_s16, 128  ;;  %p478_p1 = scmp.lt.s32.totalorder %s262_s7, %s476_s16 }
  0x37   : > { %p473_p12 = pnand %p472_p8, %p657_p9  ;;  %p479_p2 = scmp.lt.s32.totalorder %s477_s5, %s471_s11 }
  0x38   : > { %v209_v10 = vrot.slane %v208_v8, 2  ;;  %v216_v11 = vadd.f32 %v215_v9, %v214_v7 }
  0x39   : > { %p474_p0 = pneg %p473_p12  ;;  %p480_p4 = por %p479_p2, %p478_p1 }
  0x3a   : > { %v210_v12 = vadd.f32 %v209_v10, %v208_v8  ;;  %v217_v13 = vrot.slane %v216_v11, 2 }
  0x3b   : > { %p481_p5 = pnand %p480_p4, %p474_p0 }
  0x3c   : > { %v211_v14 = vrot.slane %v210_v12, 1  ;;  %v218_v15 = vadd.f32 %v217_v13, %v216_v11 }
  0x3e   : > { %v212_v16 = vadd.f32 %v211_v14, %v210_v12  ;;  %v219_v17 = vrot.slane %v218_v15, 1 }
  0x40   : > { %v220_v18 = vadd.f32 %v219_v17, %v218_v15  ;;  %v221_v19 = vmul.f32 0.25, %v212_v16 }
  0x42   : > { %v222_v20 = vmul.f32 0.25, %v220_v18  ;;  %v223_v21 = vmul.f32 %v221_v19, %v221_v19  ;;  %v228_v25 = vsub.f32 %v204_v3, %v221_v19 }
  0x44   : > { %v224_v22 = vsub.f32 %v222_v20, %v223_v21 }
  0x46   : > { %v225_v23 = vmax.f32 %v224_v22, 0.0 }
  0x48   : > { %v226_v24 = vadd.f32 1e-05, %v225_v23 }
  0x4a   : > { %441 = vrsqrt.f32 %v226_v24 }
  0x57   : > { %v442_v26 = vpop.eup %441 }
  0x58   : > { %v229_v27 = vmul.f32 %v442_v26, %v228_v25 }
  0xad   : > { %v234_v28 = vpop.permute.xlu0 %233 }
  0xae   : > { %v236_v29 = vmul.f32 %v234_v28, %v229_v27 }
  0xb1   : > { %v241_v30 = vpop.permute.xlu0 %240 }
  0xb2   : > { %v243_v31 = vadd.f32 %v241_v30, %v236_v29 }
  0xb4   : > { %244 = vst [vmem:[%s203_s30] sm:$0xf] %v243_v31 }
  0xb5   : > { %484 = shalt.err (!%p481_p5)
}
  0xb6   : > { %s485_s20 = scalar_lea.hbm %s259_s9, 64  ;;  %s489_s25 = scalar_lea.hbm %s761_s3, 256 }
  0xb7   : > { %p486_p6 = scmp.ne.s32.totalorder %s259_s9, %s485_s20  ;;  %p490_p11 = scmp.lt.s32.totalorder %s259_s9, %s761_s3 }
  0xb8   : > { %p491_p3 = scmp.lt.s32.totalorder %s489_s25, %s485_s20 }
  0xb9   : > { %p487_p7 = pnand %p486_p6, %p657_p9 }
  0xba   : > { %p492_p13 = por %p491_p3, %p490_p11 }
  0xbb   : > { %p488_p10 = pneg %p487_p7 }
  0xbd   : > { %p493_p8 = pnand %p492_p13, %p488_p10 }
  0xbf   : > { %496 = shalt.err (!%p493_p8)
}
  0xc0   : > { %363 = dma.vmem_to_hbm [thread:$0]  (%p657_p9), %s262_s7, 64, %s259_s9, %s246_s10  }
  0xc1 PF: > { %p374_p12 = scmp.ge.s32.totalorder %s567_s19, 2  ;;  %s273_s24 = sand.u32 1, %s539_s12  }
  0xc2   : > { %p769_p0 = scmp.ne.s32.totalorder %s767_s4, 0  ;;  %s274_s30 = scalar_lea.sflag [#allocation4], %s273_s24 }
  0xc4   : > { %p370_p1 = pnand %p374_p12, %p769_p0 }
  0xc6   : > { %p371_p2 = pneg %p370_p1 }
  0xc8   : > { %534 = dma.done.wait (%p371_p2), %s274_s30, 64  }
  0xc9   : > { %536 = vsyncadd (%p371_p2), %s274_s30, 4294967232  ;;  %s19_s19 = sadd.s32 1, %s567_s19   ;;  %s770_s28 = sld [smem:[#allocation8_spill]] }
  0xca   : > { %p16_p4 = scmp.ge.s32.totalorder %s19_s19, 6   ;;  %s771_s12 = smov %s543_s13 }
  0xcb   : > { %s772_s13 = smov %s547_s14  ;;  %s773_s14 = smov %s670_s6 }
  0xcc   : > { %s774_s15 = smov %s559_s17  ;;  %s775_s16 = smov %s563_s18 }
  0xcd   : > { %s776_s17 = smov %s779_s22  ;;  %18 = sbr.rel (!%p16_p4) target bundleno = 7 (0x7), region = 77 }
  0xcf   : > { %s777_s18 = smov %s770_s28 }
  0xd2   :  { %279 = vsyncpa [#allocation3], 1 }
  0xd3   :  { %281 = vsyncpa [#allocation3 + $0x1], 1 }
  0xd4   :  { %282 = vsyncpa [#allocation4], 1 }
  0xd5   :  { %284 = vsyncpa [#allocation4 + $0x1], 1 }

</bundles_post_ra>
